<compile_context>
chip_gen: v5e
topology: v5e:2x2
jax: 0.10.0
libtpu: 0.0.40
codegen_flags: <defaults>
</compile_context>

<pallas_src>
import functools

import jax
import jax.numpy as jnp
from jax.experimental import pallas as pl
from jax.experimental.pallas import tpu as pltpu


def _round_up(x: int, m: int) -> int:
    return (x + m - 1) // m * m


def _pooler_kernel(x_ref, w_ref, b_ref, o_ref):
    # x_ref: (tm, Kp)   first-token activations tile (native dtype)
    # w_ref: (Kp, Np)   dense weight, pre-transposed to (in, out), resident
    # b_ref: (1,  Np)   dense bias
    # o_ref: (tm, Np)   pooled output tile
    #
    # MXU matmul in native operand dtype, f32 accumulation.
    h = jnp.dot(x_ref[...], w_ref[...], preferred_element_type=jnp.float32)
    h = h + b_ref[...].astype(jnp.float32)
    # ReLU epilogue (VPU), then cast back to the output dtype.
    o_ref[...] = jnp.maximum(h, 0.0).astype(o_ref.dtype)


@functools.partial(jax.jit, static_argnames=("tm",))
def bert_text_pooler(hidden_states, w_t, b, *, tm=256):
    """BertTextPooler forward.

    hidden_states: [B, S, H_in]
    w_t:           [H_in, H_out]  (PyTorch nn.Linear weight, pre-transposed)
    b:             [H_out]
    returns:       [B, H_out] = relu(hidden_states[:, 0] @ w_t + b)
    """
    B, S, H_in = hidden_states.shape
    H_out = w_t.shape[1]
    dtype = hidden_states.dtype

    # First-token gather (wrapper-side layout plumbing).
    x = hidden_states[:, 0, :]                     # [B, H_in]

    # Lane-dense padding: last dims to multiples of 128 (no-op for real BERT).
    Kp = _round_up(H_in, 128)
    Np = _round_up(H_out, 128)
    if Kp != H_in:
        x = jnp.pad(x, ((0, 0), (0, Kp - H_in)))
        w_t = jnp.pad(w_t, ((0, Kp - H_in), (0, 0)))
    if Np != H_out:
        w_t = jnp.pad(w_t, ((0, 0), (0, Np - H_out)))
        b = jnp.pad(b, (0, Np - H_out))
    b2 = b.reshape(1, Np)

    M = B
    # Large row tile (multiple of 8); fall back to a full-dim block for tiny B.
    tm_eff = tm if M > tm else M
    grid = (pl.cdiv(M, tm_eff),)

    itemsize = x.dtype.itemsize
    cost = pl.CostEstimate(
        flops=2 * M * Kp * Np,
        transcendentals=0,
        bytes_accessed=(M * Kp + Kp * Np + Np + M * Np) * itemsize,
    )

    out = pl.pallas_call(
        _pooler_kernel,
        out_shape=jax.ShapeDtypeStruct((M, Np), dtype),
        grid_spec=pltpu.PrefetchScalarGridSpec(
            num_scalar_prefetch=0,
            grid=grid,
            in_specs=[
                pl.BlockSpec((tm_eff, Kp), lambda i: (i, 0)),   # activations tile
                pl.BlockSpec((Kp, Np), lambda i: (0, 0)),       # weight (resident)
                pl.BlockSpec((1, Np), lambda i: (0, 0)),        # bias (resident)
            ],
            out_specs=pl.BlockSpec((tm_eff, Np), lambda i: (i, 0)),
        ),
        compiler_params=pltpu.CompilerParams(
            dimension_semantics=("parallel",),
            vmem_limit_bytes=48 * 1024 * 1024,
        ),
        cost_estimate=cost,
    )(x, w_t, b2)

    # Strip lane padding on the output dim.
    return out[:, :H_out]


def _reference(hidden_states, w_t, b):
    x = hidden_states[:, 0, :]
    return jax.nn.relu(jnp.dot(x, w_t) + b)


if __name__ == "__main__":
    key = jax.random.PRNGKey(0)
    B, S, H_in, H_out = 2, 8, 32, 64  # batch, seq, hidden_size, bi_hidden_size

    k1, k2, k3 = jax.random.split(key, 3)
    hidden_states = jax.random.normal(k1, (B, S, H_in), dtype=jnp.float32)

    # nn.Linear-style init: weight is (out, in); kernel takes it pre-transposed.
    w = jax.random.normal(k2, (H_out, H_in), dtype=jnp.float32) * (1.0 / jnp.sqrt(H_in))
    b = jax.random.normal(k3, (H_out,), dtype=jnp.float32) * 0.02
    w_t = w.T  # (in, out)

    out = bert_text_pooler(hidden_states, w_t, b, tm=256)
    out = jax.block_until_ready(out)

    ref = _reference(hidden_states, w_t, b)
    assert out.shape == (B, H_out)
    assert jnp.allclose(out, ref, atol=1e-4, rtol=1e-4), "mismatch vs reference"

    print("KERNEL_OK")
</pallas_src>

<mosaic_0001>
module attributes {stable_mosaic.version = 11 : i64} {
  func.func @_pooler_kernel(%arg0: i32, %arg1: memref<2x128xf32, #tpu.memory_space<vmem>>, %arg2: memref<128x128xf32, #tpu.memory_space<vmem>>, %arg3: memref<1x128xf32, #tpu.memory_space<vmem>>, %arg4: memref<2x128xf32, #tpu.memory_space<vmem>>) attributes {dimension_semantics = [#tpu.dimension_semantics<parallel>], iteration_bounds = array<i64: 1>, scalar_prefetch = 0 : i64, scratch_operands = 0 : i64, tpu.core_type = #tpu.core_type<tc>, window_params = [{transform_indices = @transform_0, window_bounds = array<i64: 2, 128>}, {pipeline_mode = #tpu.pipeline_mode<synchronous>, transform_indices = @transform_1, window_bounds = array<i64: 128, 128>}, {pipeline_mode = #tpu.pipeline_mode<synchronous>, transform_indices = @transform_2, window_bounds = array<i64: 1, 128>}, {transform_indices = @transform_3, window_bounds = array<i64: 2, 128>}]} {
    %c0 = arith.constant 0 : index
    %c0_0 = arith.constant 0 : index
    %0 = vector.load %arg1[%c0, %c0_0] : memref<2x128xf32, #tpu.memory_space<vmem>>, vector<2x128xf32>
    %c0_1 = arith.constant 0 : index
    %c0_2 = arith.constant 0 : index
    %1 = vector.load %arg2[%c0_1, %c0_2] : memref<128x128xf32, #tpu.memory_space<vmem>>, vector<128x128xf32>
    %cst = arith.constant dense<0.000000e+00> : vector<2x128xf32>
    %2 = tpu.matmul %0, %1, %cst {dimension_numbers = #tpu.dot_dimension_numbers<[1], [0], [0], [1], [0, 0, 1, 1], [], []>} : vector<2x128xf32>, vector<128x128xf32>, vector<2x128xf32> -> vector<2x128xf32>
    %c0_3 = arith.constant 0 : index
    %c0_4 = arith.constant 0 : index
    %3 = vector.load %arg3[%c0_3, %c0_4] : memref<1x128xf32, #tpu.memory_space<vmem>>, vector<1x128xf32>
    %4 = vector.broadcast %3 : vector<1x128xf32> to vector<2x128xf32>
    %5 = arith.addf %2, %4 : vector<2x128xf32>
    %cst_5 = arith.constant 0.000000e+00 : f32
    %6 = vector.broadcast %cst_5 : f32 to vector<2x128xf32>
    %7 = arith.maximumf %5, %6 : vector<2x128xf32>
    %c0_6 = arith.constant 0 : index
    %c0_7 = arith.constant 0 : index
    %8 = vector.load %arg4[%c0_6, %c0_7] : memref<2x128xf32, #tpu.memory_space<vmem>>, vector<2x128xf32>
    tpu.vector_store %arg4[%c0_6, %c0_7], %7 {strides = array<i32>} : memref<2x128xf32, #tpu.memory_space<vmem>>, vector<2x128xf32>,
    return
  }
  func.func @transform_0(%arg0: i32) -> (i32, i32) {
    %c0_i32 = arith.constant 0 : i32
    %c0_i32_0 = arith.constant 0 : i32
    return %arg0, %c0_i32 : i32, i32
  }
  func.func @transform_1(%arg0: i32) -> (i32, i32) {
    %c0_i32 = arith.constant 0 : i32
    %c0_i32_0 = arith.constant 0 : i32
    %c0_i32_1 = arith.constant 0 : i32
    return %c0_i32, %c0_i32_0 : i32, i32
  }
  func.func @transform_2(%arg0: i32) -> (i32, i32) {
    %c0_i32 = arith.constant 0 : i32
    %c0_i32_0 = arith.constant 0 : i32
    %c0_i32_1 = arith.constant 0 : i32
    return %c0_i32, %c0_i32_0 : i32, i32
  }
  func.func @transform_3(%arg0: i32) -> (i32, i32) {
    %c0_i32 = arith.constant 0 : i32
    %c0_i32_0 = arith.constant 0 : i32
    return %arg0, %c0_i32 : i32, i32
  }
}

</mosaic_0001>

<bundles_post_ra>
// kernel: bert_text_pooler.1
= control target key start
LH: loop header
LB: loop body
LE: loop exit
PB: predicated region body
PF: predicated region fallthrough
CT: control target
= control target key end

     0   :  { %s180_s0 = inlined_call_operand.vmem [shape: f32[2,128], index: 0, kind: input, shape index: {}]   ;;  %s181_s1 = inlined_call_operand.vmem [shape: f32[128,128], index: 1, kind: input, shape index: {}]   ;;  %s182_s2 = inlined_call_operand.vmem [shape: f32[1,128], index: 2, kind: input, shape index: {}]   ;;  %s183_s3 = inlined_call_operand.hbm [shape: f32[2,128], index: 3, kind: output, shape index: {}]  }
   0x1   :  { %v31_v0 = vld [vmem:[%s181_s1 + $0x78] sm:$0xff]  ;;  %v30_v1 = vld [vmem:[%s181_s1 + $0x70] sm:$0xff]  ;;  %v29_v2 = vld [vmem:[%s181_s1 + $0x68] sm:$0xff] }
   0x2   :  { %36 = vmatpush.msra.mxu0 %v31_v0  ;;  %v28_v3 = vld [vmem:[%s181_s1 + $0x60] sm:$0xff]  ;;  %v27_v4 = vld [vmem:[%s181_s1 + $0x58] sm:$0xff] }
   0x4   :  { %37 = vmatpush.msra.mxu0 %v30_v1 }
   0x6   :  { %38 = vmatpush.msra.mxu0 %v29_v2 }
   0x7   :  { %8 = vsyncpa [#allocation3], 0  ;;  %v26_v5 = vld [vmem:[%s181_s1 + $0x50] sm:$0xff]  ;;  %v25_v6 = vld [vmem:[%s181_s1 + $0x48] sm:$0xff]  ;;  %s102_s21 = smov [#allocation2]   ;;  %s65_s25 = sshll.u32 %s183_s3, 4  ;;  %s66_s25 = int_to_ptr.hbm [resolvable:$true] %s65_s25 }
   0x8   :  { %39 = vmatpush.msra.mxu0 %v28_v3  ;;  %v24_v7 = vld [vmem:[%s181_s1 + $0x40] sm:$0xff]  ;;  %v23_v8 = vld [vmem:[%s181_s1 + $0x38] sm:$0xff]  ;;  %v22_v9 = vld [vmem:[%s181_s1 + $0x30] sm:$0xff]  ;;  %s63_s22 = sshll.u32 %s102_s21, 4  ;;  %s64_s22 = int_to_ptr.vmem [resolvable:$true] %s63_s22 }
   0x9   :  { %v21_v10 = vld [vmem:[%s181_s1 + $0x28] sm:$0xff]  ;;  %v20_v11 = vld [vmem:[%s181_s1 + $0x20] sm:$0xff]  ;;  %v19_v12 = vld [vmem:[%s181_s1 + $0x18] sm:$0xff] }
   0xa   :  { %40 = vmatpush.msra.mxu0 %v27_v4  ;;  %v18_v13 = vld [vmem:[%s181_s1 + $0x10] sm:$0xff]  ;;  %v17_v14 = vld [vmem:[%s181_s1 + $0x8] sm:$0xff]  ;;  %v16_v15 = vld [vmem:[%s181_s1] sm:$0xff] }
   0xb   :  { %v15_v16 = vld [vmem:[%s180_s0] sm:$0x3] }
   0xc   :  { %41 = vmatpush.msra.mxu0 %v26_v5  ;;  %v75_v17 = vld [vmem:[%s182_s2] ss:$0 sm:$0xff] }
   0xe   :  { %42 = vmatpush.msra.mxu0 %v25_v6 }
  0x10   :  { %43 = vmatpush.msra.mxu0 %v24_v7 }
  0x12   :  { %44 = vmatpush.msra.mxu0 %v23_v8 }
  0x14   :  { %45 = vmatpush.msra.mxu0 %v22_v9 }
  0x16   :  { %46 = vmatpush.msra.mxu0 %v21_v10 }
  0x18   :  { %47 = vmatpush.msra.mxu0 %v20_v11 }
  0x1a   :  { %48 = vmatpush.msra.mxu0 %v19_v12 }
  0x1c   :  { %49 = vmatpush.msra.mxu0 %v18_v13 }
  0x1e   :  { %50 = vmatpush.msra.mxu0 %v17_v14 }
  0x20   :  { %51 = vmatpush.msra.mxu0 %v16_v15 }
  0x21   :  { %52 = vmatmul.f32.vlgmr.msra.gmra.mxu0 %v15_v16 }
  0x9e   :  { %v53_v18 = vpop.f32.mrf.mxu0 }
  0x9f   :  { %v54_v19 = vadd.f32 %v75_v17, %v53_v18 }
  0xa1   :  { %v56_v20 = vmax.f32 %v54_v19, 0.0 }
  0xa3   :  { %57 = vst [vmem:[#allocation2] sm:$0x3] %v56_v20 }
  0xa4   :  { %68 = dma.vmem_to_hbm [thread:$0]  %s64_s22, 32, %s66_s25, [#allocation3]  }
  0xa5   :  { %100 = dma.done.wait [#allocation3], 32  }
  0xa6   :  { %101 = vsyncadd [#allocation3], 4294967264 }
  0xa7   :  { %73 = vsyncpa [#allocation3], 1 }

</bundles_post_ra>
